<compile_context>
chip_gen: v7x
topology: tpu7x:2x2x1
jax: 0.10.0
libtpu: 0.0.40
codegen_flags: <defaults>
</compile_context>

<pallas_src>
import jax
import jax.numpy as jnp
from jax.experimental import pallas as pl
from jax.experimental.pallas import tpu as pltpu

# Original (PyTorch) layer dims.
D_IN, D_H1, D_H2, D_OUT = 784, 300, 200, 10
# Lane-padded dims used inside the kernel (multiples of 128).
P_H1, P_H2, P_OUT = 384, 256, 128


def _round_up(x, m):
    return ((x + m - 1) // m) * m


def mlp_kernel(x_ref, w1_ref, b1_ref, w2_ref, b2_ref, w3_ref, b3_ref, o_ref):
    # x arrives f32 straight from HBM; cast to bf16 in-kernel (avoids a
    # separate wrapper pass over x).  All matmuls accumulate in f32.
    x = x_ref[...].astype(jnp.bfloat16)

    h = jnp.dot(x, w1_ref[...], preferred_element_type=jnp.float32)
    h = jnp.maximum(h + b1_ref[...], 0.0)                        # (TB, 384) f32

    h = jnp.dot(h.astype(jnp.bfloat16), w2_ref[...],
                preferred_element_type=jnp.float32)
    h = jnp.maximum(h + b2_ref[...], 0.0)                        # (TB, 256) f32

    h = jnp.dot(h.astype(jnp.bfloat16), w3_ref[...],
                preferred_element_type=jnp.float32)
    o_ref[...] = jnp.maximum(h + b3_ref[...], 0.0).astype(o_ref.dtype)


def _pick_batch_tile(B):
    """Batch tile size.

    Small batch: one tile, rounded to 16 rows (bf16 sublane pack).
    Large batch: big tiles (amortize ~0.35us/step overhead, keep MXU M full),
    multiple of 256, capped at 1024, but always >= 2 grid steps so the
    "parallel" batch axis can shard across both TensorCores on v7x.
    """
    if B <= 256:
        return _round_up(B, 16)
    half = -(-B // 2)  # ceil(B / 2)
    return min(1024, max(256, _round_up(half, 256)))


def net_forward(x, kparams):
    """x: (B, 784) float32. kparams: padded bf16 weights + padded f32 biases.

    Returns (B, 10) float32 = ReLU(L3(ReLU(L2(ReLU(L1(x)))))).
    """
    w1, b1 = kparams["w1"], kparams["b1"]
    w2, b2 = kparams["w2"], kparams["b2"]
    w3, b3 = kparams["w3"], kparams["b3"]

    B = x.shape[0]
    TB = _pick_batch_tile(B)

    # Only the single-block small-batch case needs explicit padding (cheap);
    # at large batch the ragged last tile is handled by Pallas partial blocks
    # (no cross-row reduction, tail rows are sliced away below).
    if B < TB:
        x_in = jnp.pad(x, ((0, TB - B), (0, 0)))
        out_rows = TB
    else:
        x_in = x
        out_rows = B

    n_blocks = pl.cdiv(out_rows, TB)
    grid = (n_blocks,)
    const = lambda i: (0, 0)          # weights/biases: same block every step

    rows_total = n_blocks * TB
    flops = int(2 * rows_total * (D_IN * P_H1 + P_H1 * P_H2 + P_H2 * P_OUT))
    bytes_accessed = int(
        out_rows * D_IN * 4                                # x (f32)
        + (w1.size + w2.size + w3.size) * 2                # weights (bf16)
        + (b1.size + b2.size + b3.size) * 4                # biases (f32)
        + out_rows * P_OUT * 2                             # output (bf16)
    )

    out_pad = pl.pallas_call(
        mlp_kernel,
        out_shape=jax.ShapeDtypeStruct((out_rows, P_OUT), jnp.bfloat16),
        grid=grid,
        in_specs=[
            pl.BlockSpec((TB, D_IN), lambda i: (i, 0)),    # x tile per step
            pl.BlockSpec((D_IN, P_H1), const),             # w1 resident
            pl.BlockSpec((1, P_H1), const),                # b1
            pl.BlockSpec((P_H1, P_H2), const),             # w2
            pl.BlockSpec((1, P_H2), const),                # b2
            pl.BlockSpec((P_H2, P_OUT), const),            # w3
            pl.BlockSpec((1, P_OUT), const),               # b3
        ],
        out_specs=pl.BlockSpec((TB, P_OUT), lambda i: (i, 0)),
        compiler_params=pltpu.CompilerParams(
            dimension_semantics=("parallel",),
            vmem_limit_bytes=32 * 1024 * 1024),
        cost_estimate=pl.CostEstimate(
            flops=flops, transcendentals=0, bytes_accessed=bytes_accessed),
    )(x_in, w1, b1, w2, b2, w3, b3)

    # Drop batch padding and the lane padding of the 10-wide output; restore f32.
    return out_pad[:B, :D_OUT].astype(jnp.float32)


def init_params(key):
    """PyTorch-Linear-like init (uniform +-1/sqrt(fan_in)), f32, original dims.

    Weights stored as (in, out) == transpose of PyTorch's (out, in).
    """
    dims = [(D_IN, D_H1), (D_H1, D_H2), (D_H2, D_OUT)]
    params = {}
    for i, (fan_in, fan_out) in enumerate(dims, start=1):
        key, kw, kb = jax.random.split(key, 3)
        bound = 1.0 / jnp.sqrt(float(fan_in))
        params[f"w{i}"] = jax.random.uniform(
            kw, (fan_in, fan_out), jnp.float32, -bound, bound)
        params[f"b{i}"] = jax.random.uniform(
            kb, (1, fan_out), jnp.float32, -bound, bound)
    return params


def prepare_kernel_params(params):
    """Zero-pad feature dims to lane multiples of 128; cast weights to bf16."""
    target = {
        "w1": (D_IN, P_H1), "b1": (1, P_H1),
        "w2": (P_H1, P_H2), "b2": (1, P_H2),
        "w3": (P_H2, P_OUT), "b3": (1, P_OUT),
    }
    kp = {}
    for name, (r, c) in target.items():
        a = params[name]
        a = jnp.pad(a, ((0, r - a.shape[0]), (0, c - a.shape[1])))
        kp[name] = a.astype(jnp.bfloat16 if name.startswith("w") else jnp.float32)
    return kp


def net_forward_ref(x, p):
    """Reference with the same bf16-input / f32-accumulate numerics."""
    def layer(h, w, b):
        y = jnp.dot(h.astype(jnp.bfloat16), w.astype(jnp.bfloat16),
                    preferred_element_type=jnp.float32)
        return jnp.maximum(y + b, 0.0)
    h = layer(x, p["w1"], p["b1"])
    h = layer(h, p["w2"], p["b2"])
    return layer(h, p["w3"], p["b3"])


if __name__ == "__main__":
    key = jax.random.PRNGKey(0)
    key, kx = jax.random.split(key)
    batch = 8
    x = jax.random.normal(kx, (batch, D_IN), jnp.float32)

    params = init_params(key)
    kparams = prepare_kernel_params(params)

    fwd = jax.jit(net_forward)
    out = jax.block_until_ready(fwd(x, kparams))

    ref = net_forward_ref(x, params)
    assert out.shape == (batch, D_OUT)
    assert jnp.allclose(out, ref, atol=2e-2, rtol=2e-2), float(
        jnp.max(jnp.abs(out - ref)))

    print("KERNEL_OK")
</pallas_src>

<mosaic_0001>
module attributes {stable_mosaic.version = 11 : i64} {
  func.func @mlp_kernel(%arg0: i32, %arg1: memref<16x784xf32, #tpu.memory_space<vmem>>, %arg2: memref<784x384xbf16, #tpu.memory_space<vmem>>, %arg3: memref<1x384xf32, #tpu.memory_space<vmem>>, %arg4: memref<384x256xbf16, #tpu.memory_space<vmem>>, %arg5: memref<1x256xf32, #tpu.memory_space<vmem>>, %arg6: memref<256x128xbf16, #tpu.memory_space<vmem>>, %arg7: memref<1x128xf32, #tpu.memory_space<vmem>>, %arg8: memref<16x128xbf16, #tpu.memory_space<vmem>>) attributes {dimension_semantics = [#tpu.dimension_semantics<parallel>], iteration_bounds = array<i64: 1>, scalar_prefetch = 0 : i64, scratch_operands = 0 : i64, tpu.core_type = #tpu.core_type<tc>, window_params = [{transform_indices = @transform_0, window_bounds = array<i64: 16, 784>}, {pipeline_mode = #tpu.pipeline_mode<synchronous>, transform_indices = @transform_1, window_bounds = array<i64: 784, 384>}, {pipeline_mode = #tpu.pipeline_mode<synchronous>, transform_indices = @transform_2, window_bounds = array<i64: 1, 384>}, {pipeline_mode = #tpu.pipeline_mode<synchronous>, transform_indices = @transform_3, window_bounds = array<i64: 384, 256>}, {pipeline_mode = #tpu.pipeline_mode<synchronous>, transform_indices = @transform_4, window_bounds = array<i64: 1, 256>}, {pipeline_mode = #tpu.pipeline_mode<synchronous>, transform_indices = @transform_5, window_bounds = array<i64: 256, 128>}, {pipeline_mode = #tpu.pipeline_mode<synchronous>, transform_indices = @transform_6, window_bounds = array<i64: 1, 128>}, {transform_indices = @transform_7, window_bounds = array<i64: 16, 128>}]} {
    %c0 = arith.constant 0 : index
    %c0_0 = arith.constant 0 : index
    %0 = vector.load %arg1[%c0, %c0_0] : memref<16x784xf32, #tpu.memory_space<vmem>>, vector<16x784xf32>
    %1 = arith.truncf %0 : vector<16x784xf32> to vector<16x784xbf16>
    %c0_1 = arith.constant 0 : index
    %c0_2 = arith.constant 0 : index
    %2 = vector.load %arg2[%c0_1, %c0_2] : memref<784x384xbf16, #tpu.memory_space<vmem>>, vector<784x384xbf16>
    %cst = arith.constant dense<0.000000e+00> : vector<16x384xf32>
    %3 = tpu.matmul %1, %2, %cst {dimension_numbers = #tpu.dot_dimension_numbers<[1], [0], [0], [1], [0, 0, 1, 1], [], []>} : vector<16x784xbf16>, vector<784x384xbf16>, vector<16x384xf32> -> vector<16x384xf32>
    %c0_3 = arith.constant 0 : index
    %c0_4 = arith.constant 0 : index
    %4 = vector.load %arg3[%c0_3, %c0_4] : memref<1x384xf32, #tpu.memory_space<vmem>>, vector<1x384xf32>
    %5 = vector.broadcast %4 : vector<1x384xf32> to vector<16x384xf32>
    %6 = arith.addf %3, %5 : vector<16x384xf32>
    %cst_5 = arith.constant 0.000000e+00 : f32
    %7 = vector.broadcast %cst_5 : f32 to vector<16x384xf32>
    %8 = arith.maximumf %6, %7 : vector<16x384xf32>
    %9 = arith.truncf %8 : vector<16x384xf32> to vector<16x384xbf16>
    %c0_6 = arith.constant 0 : index
    %c0_7 = arith.constant 0 : index
    %10 = vector.load %arg4[%c0_6, %c0_7] : memref<384x256xbf16, #tpu.memory_space<vmem>>, vector<384x256xbf16>
    %cst_8 = arith.constant dense<0.000000e+00> : vector<16x256xf32>
    %11 = tpu.matmul %9, %10, %cst_8 {dimension_numbers = #tpu.dot_dimension_numbers<[1], [0], [0], [1], [0, 0, 1, 1], [], []>} : vector<16x384xbf16>, vector<384x256xbf16>, vector<16x256xf32> -> vector<16x256xf32>
    %c0_9 = arith.constant 0 : index
    %c0_10 = arith.constant 0 : index
    %12 = vector.load %arg5[%c0_9, %c0_10] : memref<1x256xf32, #tpu.memory_space<vmem>>, vector<1x256xf32>
    %13 = vector.broadcast %12 : vector<1x256xf32> to vector<16x256xf32>
    %14 = arith.addf %11, %13 : vector<16x256xf32>
    %cst_11 = arith.constant 0.000000e+00 : f32
    %15 = vector.broadcast %cst_11 : f32 to vector<16x256xf32>
    %16 = arith.maximumf %14, %15 : vector<16x256xf32>
    %17 = arith.truncf %16 : vector<16x256xf32> to vector<16x256xbf16>
    %c0_12 = arith.constant 0 : index
    %c0_13 = arith.constant 0 : index
    %18 = vector.load %arg6[%c0_12, %c0_13] : memref<256x128xbf16, #tpu.memory_space<vmem>>, vector<256x128xbf16>
    %cst_14 = arith.constant dense<0.000000e+00> : vector<16x128xf32>
    %19 = tpu.matmul %17, %18, %cst_14 {dimension_numbers = #tpu.dot_dimension_numbers<[1], [0], [0], [1], [0, 0, 1, 1], [], []>} : vector<16x256xbf16>, vector<256x128xbf16>, vector<16x128xf32> -> vector<16x128xf32>
    %c0_15 = arith.constant 0 : index
    %c0_16 = arith.constant 0 : index
    %20 = vector.load %arg7[%c0_15, %c0_16] : memref<1x128xf32, #tpu.memory_space<vmem>>, vector<1x128xf32>
    %21 = vector.broadcast %20 : vector<1x128xf32> to vector<16x128xf32>
    %22 = arith.addf %19, %21 : vector<16x128xf32>
    %cst_17 = arith.constant 0.000000e+00 : f32
    %23 = vector.broadcast %cst_17 : f32 to vector<16x128xf32>
    %24 = arith.maximumf %22, %23 : vector<16x128xf32>
    %25 = arith.truncf %24 : vector<16x128xf32> to vector<16x128xbf16>
    %c0_18 = arith.constant 0 : index
    %c0_19 = arith.constant 0 : index
    %26 = vector.load %arg8[%c0_18, %c0_19] : memref<16x128xbf16, #tpu.memory_space<vmem>>, vector<16x128xbf16>
    tpu.vector_store %arg8[%c0_18, %c0_19], %25 {strides = array<i32>} : memref<16x128xbf16, #tpu.memory_space<vmem>>, vector<16x128xbf16>,
    return
  }
  func.func @transform_0(%arg0: i32) -> (i32, i32) {
    %c0_i32 = arith.constant 0 : i32
    %c0_i32_0 = arith.constant 0 : i32
    return %arg0, %c0_i32 : i32, i32
  }
  func.func @transform_1(%arg0: i32) -> (i32, i32) {
    %c0_i32 = arith.constant 0 : i32
    %c0_i32_0 = arith.constant 0 : i32
    %c0_i32_1 = arith.constant 0 : i32
    return %c0_i32, %c0_i32_0 : i32, i32
  }
  func.func @transform_2(%arg0: i32) -> (i32, i32) {
    %c0_i32 = arith.constant 0 : i32
    %c0_i32_0 = arith.constant 0 : i32
    %c0_i32_1 = arith.constant 0 : i32
    return %c0_i32, %c0_i32_0 : i32, i32
  }
  func.func @transform_3(%arg0: i32) -> (i32, i32) {
    %c0_i32 = arith.constant 0 : i32
    %c0_i32_0 = arith.constant 0 : i32
    %c0_i32_1 = arith.constant 0 : i32
    return %c0_i32, %c0_i32_0 : i32, i32
  }
  func.func @transform_4(%arg0: i32) -> (i32, i32) {
    %c0_i32 = arith.constant 0 : i32
    %c0_i32_0 = arith.constant 0 : i32
    %c0_i32_1 = arith.constant 0 : i32
    return %c0_i32, %c0_i32_0 : i32, i32
  }
  func.func @transform_5(%arg0: i32) -> (i32, i32) {
    %c0_i32 = arith.constant 0 : i32
    %c0_i32_0 = arith.constant 0 : i32
    %c0_i32_1 = arith.constant 0 : i32
    return %c0_i32, %c0_i32_0 : i32, i32
  }
  func.func @transform_6(%arg0: i32) -> (i32, i32) {
    %c0_i32 = arith.constant 0 : i32
    %c0_i32_0 = arith.constant 0 : i32
    %c0_i32_1 = arith.constant 0 : i32
    return %c0_i32, %c0_i32_0 : i32, i32
  }
  func.func @transform_7(%arg0: i32) -> (i32, i32) {
    %c0_i32 = arith.constant 0 : i32
    %c0_i32_0 = arith.constant 0 : i32
    return %arg0, %c0_i32 : i32, i32
  }
}

</mosaic_0001>

<bundles_post_ra>
// kernel: net_forward.1
= control target key start
LH: loop header
LB: loop body
LE: loop exit
PB: predicated region body
PF: predicated region fallthrough
CT: control target
= control target key end

     0   :  { %12 = vsyncpa [#allocation3], 0  ;;  %s2908_s0 = inlined_call_operand.vmem [shape: f32[16,784], index: 0, kind: input, shape index: {}]   ;;  %s2909_s1 = inlined_call_operand.hbm [shape: bf16[784,384], index: 1, kind: input, shape index: {}]   ;;  %s2910_s2 = inlined_call_operand.vmem [shape: f32[1,384], index: 2, kind: input, shape index: {}]   ;;  %s2911_s3 = inlined_call_operand.hbm [shape: bf16[384,256], index: 3, kind: input, shape index: {}]   ;;  %s2912_s4 = inlined_call_operand.vmem [shape: f32[1,256], index: 4, kind: input, shape index: {}]   ;;  %s2913_s5 = inlined_call_operand.vmem [shape: bf16[256,128], index: 5, kind: input, shape index: {}]   ;;  %s2914_s6 = inlined_call_operand.vmem [shape: f32[1,128], index: 6, kind: input, shape index: {}]   ;;  %s2915_s7 = inlined_call_operand.vmem [shape: bf16[16,128], index: 7, kind: output, shape index: {}]  }
   0x1   :  { %13 = vsyncpa [#allocation5], 0  ;;  %s2692_s24 = smov [#allocation2]   ;;  %s2644_s28 = scalar_lea.hbm %s2909_s1, 18816 }
   0x2   :  { %s21_s25 = sshll.u32 %s2692_s24, 4  ;;  %p2645_p0 = scmp.ne.s32.totalorder %s2909_s1, %s2644_s28  ;;  %s22_s25 = int_to_ptr.vmem [resolvable:$true] %s21_s25 }
   0x3   :  { %p2648_p1 = scmp.lt.u32.totalorder %s2644_s28, %s2909_s1 }
   0x5   :  { %p2650_p2 = pnand %p2648_p1, %p2645_p0 }
   0x7   :  { %2653 = shalt.err (!%p2650_p2)
}
   0x8   :  { %s2654_s10 = scalar_lea.vmem %s22_s25, 18816  ;;  %p2659_p4 = scmp.lt.s32.totalorder %s22_s25, %s22_s25 }
   0x9   :  { %p2655_p3 = scmp.ne.s32.totalorder %s22_s25, %s2654_s10  ;;  %p2660_p5 = scmp.lt.s32.totalorder %s2654_s10, %s2654_s10 }
   0xb   :  { %p2661_p6 = por %p2660_p5, %p2659_p4 }
   0xd   :  { %p2662_p7 = pnand %p2661_p6, %p2655_p3 }
   0xf   :  { %2665 = shalt.err (!%p2662_p7)
}
  0x10   :  { %s2693_s11 = smov 192   ;;  %s2694_s12 = smov 12  }
  0x11   :  { %27 = dma.hbm_to_vmem [thread:$0]  %s2909_s1, 18816, %s22_s25, [#allocation3], %s2693_s11, %s2693_s11, %s2694_s12  }
  0x12   :  { %s2695_s15 = smov [#allocation4]   ;;  %s2666_s19 = scalar_lea.hbm %s2911_s3, 6144 }
  0x13   :  { %s35_s16 = sshll.u32 %s2695_s15, 4  ;;  %p2667_p8 = scmp.ne.s32.totalorder %s2911_s3, %s2666_s19  ;;  %s36_s16 = int_to_ptr.vmem [resolvable:$true] %s35_s16 }
  0x14   :  { %p2670_p9 = scmp.lt.u32.totalorder %s2666_s19, %s2911_s3 }
  0x16   :  { %p2672_p10 = pnand %p2670_p9, %p2667_p8 }
  0x18   :  { %2675 = shalt.err (!%p2672_p10)
}
  0x19   :  { %s2676_s24 = scalar_lea.vmem %s36_s16, 6144  ;;  %p2681_p12 = scmp.lt.s32.totalorder %s36_s16, %s36_s16 }
  0x1a   :  { %p2677_p11 = scmp.ne.s32.totalorder %s36_s16, %s2676_s24  ;;  %p2682_p13 = scmp.lt.s32.totalorder %s2676_s24, %s2676_s24 }
  0x1c   :  { %p2683_p0 = por %p2682_p13, %p2681_p12 }
  0x1e   :  { %p2684_p1 = pnand %p2683_p0, %p2677_p11 }
  0x20   :  { %2687 = shalt.err (!%p2684_p1)
}
  0x21   :  { %s2696_s1 = smov 128   ;;  %s2697_s25 = smov 8  }
  0x22   :  { %41 = dma.hbm_to_vmem [thread:$0]  %s2911_s3, 6144, %s36_s16, [#allocation5], %s2696_s1, %s2696_s1, %s2697_s25  }
  0x23   :  { %2688 = dma.done.wait [#allocation3], 18816  }
  0x24   :  { %2689 = vsyncadd [#allocation3], 4294948480 }
  0x25   :  { %2690 = dma.done.wait [#allocation5], 6144  }
  0x26   :  { %2691 = vsyncadd [#allocation5], 4294961152  ;;  %v2698_v0 = vmov 0   ;;  %v2360_v1 = vld [vmem:[#allocation2 + $0x4] ss:$12 sps:$4 sm:$0xff]   ;;  %v68_v19 = vld [vmem:[%s2908_s0 + $0x68] sm:$0xff] }
  0x27   :  { %1238 = vmatprep.mubr.bf16.mxu1 %v2698_v0  ;;  %v2362_v2 = vld [vmem:[#allocation2] ss:$12 sps:$4 sm:$0xff]   ;;  %1077 = vmatprep.subr.bf16.mxu0 %v2360_v1  ;;  %v2363_v3 = vld [vmem:[#allocation2 + $0x1c] ss:$12 sps:$4 sm:$0xff]   ;;  %v2365_v4 = vld [vmem:[#allocation2 + $0x18] ss:$12 sps:$4 sm:$0xff]  }
  0x28   :  { %1078 = vmatpush1.bf16.msra.mxu0 %v2362_v2  ;;  %v2366_v5 = vld [vmem:[#allocation2 + $0x34] ss:$12 sps:$4 sm:$0xff]   ;;  %v2368_v6 = vld [vmem:[#allocation2 + $0x30] ss:$12 sps:$4 sm:$0xff]   ;;  %v2369_v7 = vld [vmem:[#allocation2 + $0x4c] ss:$12 sps:$4 sm:$0xff]  }
  0x29   :  { %1079 = vmatprep.subr.bf16.mxu0 %v2363_v3  ;;  %v2371_v8 = vld [vmem:[#allocation2 + $0x48] ss:$12 sps:$4 sm:$0xff]   ;;  %v2372_v9 = vld [vmem:[#allocation2 + $0x64] ss:$12 sps:$4 sm:$0xff]   ;;  %v2374_v10 = vld [vmem:[#allocation2 + $0x60] ss:$12 sps:$4 sm:$0xff]  }
  0x2a   :  { %v2375_v11 = vld [vmem:[#allocation2 + $0x7c] ss:$12 sps:$4 sm:$0xff]   ;;  %v2377_v12 = vld [vmem:[#allocation2 + $0x78] ss:$12 sps:$4 sm:$0xff]   ;;  %v2404_v14 = vld [vmem:[#allocation2 + $0x480] ss:$12 sps:$4 sm:$0xff]  }
  0x2b   :  { %v2402_v13 = vld [vmem:[#allocation2 + $0x484] ss:$12 sps:$4 sm:$0xff]   ;;  %v2378_v15 = vld [vmem:[#allocation2 + $0x94] ss:$12 sps:$4 sm:$0xff]   ;;  %vm1073_vm0 = vcmask 130048   ;;  %v56_v26 = vld [vmem:[%s2908_s0 + $0x8] sm:$0xff] }
  0x2c   :  { %1080 = vmatpush1.bf16.msra.mxu0 %v2365_v4  ;;  %v2380_v16 = vld [vmem:[#allocation2 + $0x90] ss:$12 sps:$4 sm:$0xff]   ;;  %1206 = vmatprep.subr.bf16.mxu1 %v2402_v13  ;;  %v2408_v17 = vld [vmem:[#allocation2 + $0xc8] ss:$12 sps:$4 sm:$0xff]   ;;  %v2381_v22 = vld [vmem:[#allocation2 + $0xac] ss:$12 sps:$4 sm:$0xff]  }
  0x2d   :  { %1081 = vmatprep.subr.bf16.mxu0 %v2366_v5  ;;  %1207 = vmatpush1.bf16.msra.mxu1 %v2404_v14  ;;  %v61_v18 = vld [vmem:[%s2908_s0 + $0x30] sm:$0xff]  ;;  %v2413_v24 = vld [vmem:[#allocation2 + $0xe0] ss:$12 sps:$4 sm:$0xff]   ;;  %v2418_v31 = vld [vmem:[#allocation2 + $0xf8] ss:$12 sps:$4 sm:$0xff]   ;;  %vm2700_vm1 = vmmov 0  }
  0x2e   :  { %v2772_v20 = vpack.c.bf16 %v68_v19, %v61_v18  ;;  %v2409_v21 = vld [vmem:[#allocation2 + $0x8] ss:$12 sps:$4 sm:$0xff]   ;;  %2231 = vmatprep.subr.bf16.mxu1 %v2408_v17  ;;  %v2414_v25 = vld [vmem:[#allocation2 + $0x20] ss:$12 sps:$4 sm:$0xff]   ;;  %v2384_v28 = vld [vmem:[#allocation2 + $0xc4] ss:$12 sps:$4 sm:$0xff]  }
  0x2f   :  { %v2383_v23 = vld [vmem:[#allocation2 + $0xa8] ss:$12 sps:$4 sm:$0xff]   ;;  %v63_v27 = vld [vmem:[%s2908_s0 + $0x40] sm:$0xff]  ;;  %v2423_v35 = vld [vmem:[#allocation2 + $0x110] ss:$12 sps:$4 sm:$0xff]  }
  0x30   :  { %1082 = vmatpush1.bf16.msra.mxu0 %v2368_v6  ;;  %2155 = vmatmul.mubr.msk.bf16.vlgmr.msra.gmra.mrb[0].mxu1 %vm1073_vm0, %v2772_v20  ;;  %v70_v29 = vpack.c.bf16 %v63_v27, %v56_v26  ;;  %v2386_v30 = vld [vmem:[#allocation2 + $0xc0] ss:$12 sps:$4 sm:$0xff]   ;;  %v2419_v32 = vld [vmem:[#allocation2 + $0x38] ss:$12 sps:$4 sm:$0xff]   ;;  %v2387_v33 = vld [vmem:[#allocation2 + $0xdc] ss:$12 sps:$4 sm:$0xff]  }
  0x31   :  { %1083 = vmatprep.subr.bf16.mxu0 %v2369_v7  ;;  %2232 = vmatpush3.bf16.msra.mxu1 %v2409_v21  ;;  %v2389_v34 = vld [vmem:[#allocation2 + $0xd8] ss:$12 sps:$4 sm:$0xff]   ;;  %v2424_v36 = vld [vmem:[#allocation2 + $0x50] ss:$12 sps:$4 sm:$0xff]   ;;  %v2390_v37 = vld [vmem:[#allocation2 + $0xf4] ss:$12 sps:$4 sm:$0xff]  }
  0x32   :  { %2233 = vmatprep.subr.bf16.mxu1 %v2413_v24  ;;  %1109 = vmatprep.mubr.bf16.mxu0 %v70_v29  ;;  %v2428_v38 = vld [vmem:[#allocation2 + $0x128] ss:$12 sps:$4 sm:$0xff]   ;;  %v2392_v40 = vld [vmem:[#allocation2 + $0xf0] ss:$12 sps:$4 sm:$0xff]   ;;  %v2393_v41 = vld [vmem:[#allocation2 + $0x10c] ss:$12 sps:$4 sm:$0xff]  }
  0x33   :  { %1281 = vmatprep.mubr.bf16.mxu1 %v70_v29  ;;  %v2429_v39 = vld [vmem:[#allocation2 + $0x68] ss:$12 sps:$4 sm:$0xff]   ;;  %v2433_v42 = vld [vmem:[#allocation2 + $0x140] ss:$12 sps:$4 sm:$0xff]   ;;  %v2396_v45 = vld [vmem:[#allocation2 + $0x124] ss:$12 sps:$4 sm:$0xff]  }
  0x34   :  { %1084 = vmatpush1.bf16.msra.mxu0 %v2371_v8  ;;  %v2395_v43 = vld [vmem:[#allocation2 + $0x108] ss:$12 sps:$4 sm:$0xff]   ;;  %v2434_v44 = vld [vmem:[#allocation2 + $0x80] ss:$12 sps:$4 sm:$0xff]   ;;  %v2438_v46 = vld [vmem:[#allocation2 + $0x158] ss:$12 sps:$4 sm:$0xff]  }
  0x35   :  { %1085 = vmatprep.subr.bf16.mxu0 %v2372_v9  ;;  %2234 = vmatpush3.bf16.msra.mxu1 %v2414_v25  ;;  %v2398_v47 = vld [vmem:[#allocation2 + $0x120] ss:$12 sps:$4 sm:$0xff]   ;;  %v2439_v48 = vld [vmem:[#allocation2 + $0x98] ss:$12 sps:$4 sm:$0xff]   ;;  %v2443_v49 = vld [vmem:[#allocation2 + $0x170] ss:$12 sps:$4 sm:$0xff]  }
  0x36   :  { %2235 = vmatprep.subr.bf16.mxu1 %v2418_v31  ;;  %v2399_v50 = vld [vmem:[#allocation2 + $0x13c] ss:$12 sps:$4 sm:$0xff]   ;;  %v2401_v51 = vld [vmem:[#allocation2 + $0x138] ss:$12 sps:$4 sm:$0xff]   ;;  %v2405_v52 = vld [vmem:[#allocation2 + $0x154] ss:$12 sps:$4 sm:$0xff]  }
  0x37   :  { %v55_v53 = vld [vmem:[%s2908_s0] sm:$0xff]  ;;  %v2444_v54 = vld [vmem:[#allocation2 + $0xb0] ss:$12 sps:$4 sm:$0xff]   ;;  %v2448_v55 = vld [vmem:[#allocation2 + $0x248] ss:$12 sps:$4 sm:$0xff]  }
  0x38   :  { %1086 = vmatpush1.bf16.msra.mxu0 %v2374_v10  ;;  %v62_v56 = vld [vmem:[%s2908_s0 + $0x38] sm:$0xff]  ;;  %v2449_v58 = vld [vmem:[#allocation2 + $0x188] ss:$12 sps:$4 sm:$0xff]   ;;  %v2453_v60 = vld [vmem:[#allocation2 + $0x260] ss:$12 sps:$4 sm:$0xff]  }
  0x39   :  { %1087 = vmatprep.subr.bf16.mxu0 %v2375_v11  ;;  %2236 = vmatpush3.bf16.msra.mxu1 %v2419_v32  ;;  %v2407_v57 = vld [vmem:[#allocation2 + $0x150] ss:$12 sps:$4 sm:$0xff]   ;;  %v69_v59 = vpack.c.bf16 %v62_v56, %v55_v53  ;;  %v2410_v61 = vld [vmem:[#allocation2 + $0x16c] ss:$12 sps:$4 sm:$0xff]   ;;  %v2412_v63 = vld [vmem:[#allocation2 + $0x168] ss:$12 sps:$4 sm:$0xff]  }
  0x3a   :  { %2237 = vmatprep.subr.bf16.mxu1 %v2423_v35  ;;  %v2454_v62 = vld [vmem:[#allocation2 + $0x1a0] ss:$12 sps:$4 sm:$0xff]   ;;  %v2458_v1 = vld [vmem:[#allocation2 + $0x278] ss:$12 sps:$4 sm:$0xff]   ;;  %v2463_v5 = vld [vmem:[#allocation2 + $0x290] ss:$12 sps:$4 sm:$0xff]  }
  0x3b   :  { %v2417_v2 = vld [vmem:[#allocation2 + $0x184] ss:$12 sps:$4 sm:$0xff]   ;;  %v2415_v3 = vld [vmem:[#allocation2 + $0x180] ss:$12 sps:$4 sm:$0xff]   ;;  %v2422_v6 = vld [vmem:[#allocation2 + $0x19c] ss:$12 sps:$4 sm:$0xff]  }
  0x3c   :  { %1088 = vmatpush1.bf16.msra.mxu0 %v2377_v12  ;;  %v2459_v4 = vld [vmem:[#allocation2 + $0x1b8] ss:$12 sps:$4 sm:$0xff]   ;;  %v2464_v8 = vld [vmem:[#allocation2 + $0x1d0] ss:$12 sps:$4 sm:$0xff]   ;;  %v2468_v9 = vld [vmem:[#allocation2 + $0x2a8] ss:$12 sps:$4 sm:$0xff]  }
  0x3d   :  { %1089 = vmatprep.subr.bf16.mxu0 %v2378_v15  ;;  %2238 = vmatpush3.bf16.msra.mxu1 %v2424_v36  ;;  %v2420_v7 = vld [vmem:[#allocation2 + $0x198] ss:$12 sps:$4 sm:$0xff]   ;;  %v2427_v10 = vld [vmem:[#allocation2 + $0x1b4] ss:$12 sps:$4 sm:$0xff]   ;;  %v2425_v11 = vld [vmem:[#allocation2 + $0x1b0] ss:$12 sps:$4 sm:$0xff]  }
  0x3e   :  { %2239 = vmatprep.subr.bf16.mxu1 %v2428_v38  ;;  %v2469_v12 = vld [vmem:[#allocation2 + $0x1e8] ss:$12 sps:$4 sm:$0xff]   ;;  %v2473_v13 = vld [vmem:[#allocation2 + $0x2c0] ss:$12 sps:$4 sm:$0xff]   ;;  %v2478_v17 = vld [vmem:[#allocation2 + $0x2d8] ss:$12 sps:$4 sm:$0xff]  }
  0x3f   :  { %v2432_v14 = vld [vmem:[#allocation2 + $0x1cc] ss:$12 sps:$4 sm:$0xff]   ;;  %v2430_v15 = vld [vmem:[#allocation2 + $0x1c8] ss:$12 sps:$4 sm:$0xff]   ;;  %v2437_v18 = vld [vmem:[#allocation2 + $0x1e4] ss:$12 sps:$4 sm:$0xff]  }
  0x40   :  { %1090 = vmatpush1.bf16.msra.mxu0 %v2380_v16  ;;  %v2474_v16 = vld [vmem:[#allocation2 + $0x200] ss:$12 sps:$4 sm:$0xff]   ;;  %v58_v19 = vld [vmem:[%s2908_s0 + $0x18] sm:$0xff]  ;;  %v65_v21 = vld [vmem:[%s2908_s0 + $0x50] sm:$0xff] }
  0x41   :  { %1091 = vmatprep.subr.bf16.mxu0 %v2381_v22  ;;  %2240 = vmatpush3.bf16.msra.mxu1 %v2429_v39  ;;  %v2435_v22 = vld [vmem:[#allocation2 + $0x1e0] ss:$12 sps:$4 sm:$0xff]   ;;  %v2479_v24 = vld [vmem:[#allocation2 + $0x218] ss:$12 sps:$4 sm:$0xff]   ;;  %v72_v25 = vpack.c.bf16 %v65_v21, %v58_v19  ;;  %v2483_v26 = vld [vmem:[#allocation2 + $0x2f0] ss:$12 sps:$4 sm:$0xff]  }
  0x42   :  { %2241 = vmatprep.subr.bf16.mxu1 %v2433_v42  ;;  %v2484_v27 = vld [vmem:[#allocation2 + $0x230] ss:$12 sps:$4 sm:$0xff]   ;;  %v2488_v31 = vld [vmem:[#allocation2 + $0x3c8] ss:$12 sps:$4 sm:$0xff]   ;;  %v2493_v36 = vld [vmem:[#allocation2 + $0x3e0] ss:$12 sps:$4 sm:$0xff]  }
  0x43   :  { %v57_v29 = vld [vmem:[%s2908_s0 + $0x10] sm:$0xff]  ;;  %v2494_v39 = vld [vmem:[#allocation2 + $0x320] ss:$12 sps:$4 sm:$0xff]   ;;  %v2500_v21 = vld [vmem:[#allocation2 + $0x318] ss:$12 sps:$4 sm:$0xff]  }
  0x44   :  { %1092 = vmatpush1.bf16.msra.mxu0 %v2383_v23  ;;  %v2442_v23 = vld [vmem:[#allocation2 + $0x1fc] ss:$12 sps:$4 sm:$0xff]   ;;  %v2447_v32 = vld [vmem:[#allocation2 + $0x214] ss:$12 sps:$4 sm:$0xff]   ;;  %v2472_v53 = vld [vmem:[#allocation2 + $0x28c] ss:$12 sps:$4 sm:$0xff]  }
  0x45   :  { %1093 = vmatprep.subr.bf16.mxu0 %v2384_v28  ;;  %2242 = vmatpush3.bf16.msra.mxu1 %v2434_v44  ;;  %v2440_v28 = vld [vmem:[#allocation2 + $0x1f8] ss:$12 sps:$4 sm:$0xff]   ;;  %v2445_v35 = vld [vmem:[#allocation2 + $0x210] ss:$12 sps:$4 sm:$0xff]   ;;  %v2450_v38 = vld [vmem:[#allocation2 + $0x228] ss:$12 sps:$4 sm:$0xff]  }
  0x46   :  { %2243 = vmatprep.subr.bf16.mxu1 %v2438_v46  ;;  %v2455_v42 = vld [vmem:[#allocation2 + $0x240] ss:$12 sps:$4 sm:$0xff]   ;;  %v2503_v44 = vld [vmem:[#allocation2 + $0x410] ss:$12 sps:$4 sm:$0xff]   ;;  %v2460_v46 = vld [vmem:[#allocation2 + $0x258] ss:$12 sps:$4 sm:$0xff]  }
  0x47   :  { %v67_v56 = vld [vmem:[%s2908_s0 + $0x60] sm:$0xff]  ;;  %v2559_v19 = vld [vmem:[#allocation4 + $0x10] ss:$8 sps:$4 sm:$0xff]  }
  0x48   :  { %1094 = vmatpush1.bf16.msra.mxu0 %v2386_v30  ;;  %v64_v30 = vld [vmem:[%s2908_s0 + $0x48] sm:$0xff] }
  0x49   :  { %1095 = vmatprep.subr.bf16.mxu0 %v2387_v33  ;;  %2244 = vmatpush3.bf16.msra.mxu1 %v2439_v48  ;;  %v2800_v33 = vpack.c.bf16 %v64_v30, %v57_v29  ;;  %v2508_v48 = vld [vmem:[#allocation2 + $0x428] ss:$12 sps:$4 sm:$0xff]   ;;  %v2520_v30 = vld [vmem:[#allocation2 + $0x378] ss:$12 sps:$4 sm:$0xff]  }
  0x4a   :  { %2245 = vmatprep.subr.bf16.mxu1 %v2443_v49  ;;  %v2467_v49 = vld [vmem:[#allocation2 + $0x274] ss:$12 sps:$4 sm:$0xff]   ;;  %v2522_v29 = vld [vmem:[#allocation2 + $0x37c] ss:$12 sps:$4 sm:$0xff]  }
  0x4c   :  { %1096 = vmatpush1.bf16.msra.mxu0 %v2389_v34  ;;  %v2489_v34 = vld [vmem:[#allocation2 + $0x308] ss:$12 sps:$4 sm:$0xff]  }
  0x4d   :  { %1097 = vmatprep.subr.bf16.mxu0 %v2390_v37  ;;  %2246 = vmatpush3.bf16.msra.mxu1 %v2444_v54  ;;  %v2452_v37 = vld [vmem:[#allocation2 + $0x22c] ss:$12 sps:$4 sm:$0xff]  }
  0x4e   :  { %2253 = vmatprep.subr.bf16.mxu1 %v2448_v55  ;;  %v60_v54 = vld [vmem:[%s2908_s0 + $0x28] sm:$0xff] }
  0x4f   :  { %v2470_v55 = vld [vmem:[#allocation2 + $0x288] ss:$12 sps:$4 sm:$0xff]  }
  0x50   :  { %1098 = vmatpush1.bf16.msra.mxu0 %v2392_v40  ;;  %1282 = vmatmul.mubr.bf16.vlgmr.msra.gmra.mrb[4].mxu1 %v69_v59  ;;  %v2498_v40 = vld [vmem:[#allocation2 + $0x3f8] ss:$12 sps:$4 sm:$0xff]  }
  0x51   :  { %1099 = vmatprep.subr.bf16.mxu0 %v2393_v41  ;;  %2254 = vmatpush3.bf16.msra.mxu1 %v2449_v58  ;;  %v2457_v41 = vld [vmem:[#allocation2 + $0x244] ss:$12 sps:$4 sm:$0xff]   ;;  %v74_v58 = vpack.c.bf16 %v67_v56, %v60_v54  ;;  %v2573_v56 = vld [vmem:[#allocation4 + $0x54] ss:$8 sps:$4 sm:$0xff]  }
  0x52   :  { %2255 = vmatprep.subr.bf16.mxu1 %v2453_v60  ;;  %1322 = vmatprep.mubr.bf16.mxu1 %v72_v25  ;;  %v2477_v60 = vld [vmem:[#allocation2 + $0x2a4] ss:$12 sps:$4 sm:$0xff]  }
  0x53   :  { %v2570_v54 = vld [vmem:[#allocation4 + $0x44] ss:$8 sps:$4 sm:$0xff]  }
  0x54   :  { %1100 = vmatpush1.bf16.msra.mxu0 %v2395_v43  ;;  %v2499_v43 = vld [vmem:[#allocation2 + $0x338] ss:$12 sps:$4 sm:$0xff]  }
  0x55   :  { %1101 = vmatprep.subr.bf16.mxu0 %v2396_v45  ;;  %2256 = vmatpush3.bf16.msra.mxu1 %v2454_v62  ;;  %v2462_v45 = vld [vmem:[#allocation2 + $0x25c] ss:$12 sps:$4 sm:$0xff]   ;;  %v2519_v62 = vld [vmem:[#allocation2 + $0x398] ss:$12 sps:$4 sm:$0xff]  }
  0x56   :  { %2257 = vmatprep.subr.bf16.mxu1 %v2458_v1  ;;  %v2482_v1 = vld [vmem:[#allocation2 + $0x2bc] ss:$12 sps:$4 sm:$0xff]  }
  0x58   :  { %1102 = vmatpush1.bf16.msra.mxu0 %v2398_v47  ;;  %v2504_v47 = vld [vmem:[#allocation2 + $0x350] ss:$12 sps:$4 sm:$0xff]  }
  0x59   :  { %1103 = vmatprep.subr.bf16.mxu0 %v2399_v50  ;;  %2258 = vmatpush3.bf16.msra.mxu1 %v2459_v4  ;;  %v2465_v50 = vld [vmem:[#allocation2 + $0x270] ss:$12 sps:$4 sm:$0xff]  }
  0x5a   :  { %2259 = vmatprep.subr.bf16.mxu1 %v2463_v5  ;;  %v66_v4 = vld [vmem:[%s2908_s0 + $0x58] sm:$0xff] }
  0x5b   :  { %v2480_v5 = vld [vmem:[#allocation2 + $0x2b8] ss:$12 sps:$4 sm:$0xff]  }
  0x5c   :  { %1104 = vmatpush1.bf16.msra.mxu0 %v2401_v51  ;;  %v2509_v51 = vld [vmem:[#allocation2 + $0x368] ss:$12 sps:$4 sm:$0xff]  }
  0x5d   :  { %1105 = vmatprep.subr.bf16.mxu0 %v2405_v52  ;;  %2260 = vmatpush3.bf16.msra.mxu1 %v2464_v8  ;;  %v2513_v52 = vld [vmem:[#allocation2 + $0x440] ss:$12 sps:$4 sm:$0xff]   ;;  %v2485_v8 = vld [vmem:[#allocation2 + $0x2d0] ss:$12 sps:$4 sm:$0xff]  }
  0x5e   :  { %2261 = vmatprep.subr.bf16.mxu1 %v2468_v9  ;;  %v2531_v9 = vld [vmem:[#allocation2 + $0x488] ss:$12 sps:$4 sm:$0xff]  }
  0x60   :  { %1106 = vmatpush1.bf16.msra.mxu0 %v2407_v57  ;;  %v2514_v57 = vld [vmem:[#allocation2 + $0x380] ss:$12 sps:$4 sm:$0xff]  }
  0x61   :  { %1107 = vmatprep.subr.bf16.mxu0 %v2410_v61  ;;  %2262 = vmatpush3.bf16.msra.mxu1 %v2469_v12  ;;  %v2475_v61 = vld [vmem:[#allocation2 + $0x2a0] ss:$12 sps:$4 sm:$0xff]   ;;  %v2558_v12 = vld [vmem:[#allocation4 + $0x4] ss:$8 sps:$4 sm:$0xff]  }
  0x62   :  { %2263 = vmatprep.subr.bf16.mxu1 %v2473_v13  ;;  %v2490_v13 = vld [vmem:[#allocation2 + $0x2e8] ss:$12 sps:$4 sm:$0xff]  }
  0x64   :  { %1108 = vmatpush1.bf16.msra.mxu0 %v2412_v63  ;;  %v2523_v63 = vld [vmem:[#allocation2 + $0x470] ss:$12 sps:$4 sm:$0xff]  }
  0x65   :  { %1120 = vmatprep.subr.bf16.mxu0 %v2417_v2  ;;  %2264 = vmatpush3.bf16.msra.mxu1 %v2474_v16  ;;  %v2524_v2 = vld [vmem:[#allocation2 + $0x3b0] ss:$12 sps:$4 sm:$0xff]   ;;  %v2495_v16 = vld [vmem:[#allocation2 + $0x300] ss:$12 sps:$4 sm:$0xff]  }
  0x66   :  { %2265 = vmatprep.subr.bf16.mxu1 %v2478_v17  ;;  %v2502_v17 = vld [vmem:[#allocation2 + $0x31c] ss:$12 sps:$4 sm:$0xff]  }
  0x67   :  { %1110 = vmatmul.mubr.bf16.vlgmr.msra.gmra.mrb[0].mxu0 %v69_v59  ;;  %v2518_v59 = vld [vmem:[#allocation2 + $0x458] ss:$12 sps:$4 sm:$0xff]  }
  0x68   :  { %1121 = vmatpush1.bf16.msra.mxu0 %v2415_v3  ;;  %1152 = vmatprep.mubr.bf16.mxu0 %v72_v25  ;;  %v59_v3 = vld [vmem:[%s2908_s0 + $0x20] sm:$0xff]  ;;  %v2510_v25 = vld [vmem:[#allocation2 + $0x348] ss:$12 sps:$4 sm:$0xff]  }
  0x69   :  { %1122 = vmatprep.subr.bf16.mxu0 %v2422_v6  ;;  %2266 = vmatpush3.bf16.msra.mxu1 %v2479_v24  ;;  %v2487_v6 = vld [vmem:[#allocation2 + $0x2d4] ss:$12 sps:$4 sm:$0xff]   ;;  %v2512_v24 = vld [vmem:[#allocation2 + $0x34c] ss:$12 sps:$4 sm:$0xff]  }
  0x6a   :  { %2267 = vmatprep.subr.bf16.mxu1 %v2483_v26  ;;  %v2517_v26 = vld [vmem:[#allocation2 + $0x364] ss:$12 sps:$4 sm:$0xff]  }
  0x6c   :  { %1123 = vmatpush1.bf16.msra.mxu0 %v2420_v7  ;;  %v2815_v7 = vpack.c.bf16 %v66_v4, %v59_v3  ;;  %v2586_v3 = vld [vmem:[#allocation4 + $0xa0] ss:$8 sps:$4 sm:$0xff]   ;;  %v2591_v4 = vld [vmem:[#allocation4 + $0xb4] ss:$8 sps:$4 sm:$0xff]  }
  0x6d   :  { %1124 = vmatprep.subr.bf16.mxu0 %v2427_v10  ;;  %2268 = vmatpush3.bf16.msra.mxu1 %v2484_v27  ;;  %v2492_v10 = vld [vmem:[#allocation2 + $0x2ec] ss:$12 sps:$4 sm:$0xff]  }
  0x6e   :  { %2275 = vmatprep.subr.bf16.mxu1 %v2488_v31  ;;  %v2562_v27 = vld [vmem:[#allocation4 + $0x20] ss:$8 sps:$4 sm:$0xff]  }
  0x6f   :  { %v2527_v31 = vld [vmem:[#allocation2 + $0x394] ss:$12 sps:$4 sm:$0xff]  }
  0x70   :  { %1125 = vmatpush1.bf16.msra.mxu0 %v2425_v11  ;;  %1323 = vmatmul.mubr.bf16.vlgmr.msra.gmra.mrb[8].mxu1 %v2800_v33  ;;  %v2699_v11 = vmov 0.0  }
  0x71   :  { %1126 = vmatprep.subr.bf16.mxu0 %v2432_v14  ;;  %2276 = vmatpush3.bf16.msra.mxu1 %v2489_v34  ;;  %v2497_v14 = vld [vmem:[#allocation2 + $0x304] ss:$12 sps:$4 sm:$0xff]   ;;  %v2528_v34 = vld [vmem:[#allocation2 + $0x3a8] ss:$12 sps:$4 sm:$0xff]  }
  0x72   :  { %2277 = vmatprep.subr.bf16.mxu1 %v2493_v36  ;;  %1363 = vmatprep.mubr.bf16.mxu1 %v74_v58  ;;  %v2532_v36 = vld [vmem:[#allocation2 + $0x3c0] ss:$12 sps:$4 sm:$0xff]  }
  0x74   :  { %1127 = vmatpush1.bf16.msra.mxu0 %v2430_v15  ;;  %v2556_v15 = vld [vmem:[#allocation4] ss:$8 sps:$4 sm:$0xff]  }
  0x75   :  { %1128 = vmatprep.subr.bf16.mxu0 %v2437_v18  ;;  %2278 = vmatpush3.bf16.msra.mxu1 %v2494_v39  ;;  %v2561_v18 = vld [vmem:[#allocation4 + $0x14] ss:$8 sps:$4 sm:$0xff]  }
  0x76   :  { %2279 = vmatprep.subr.bf16.mxu1 %v2498_v40  ;;  %v2540_v39 = vld [vmem:[#allocation2 + $0x3f4] ss:$12 sps:$4 sm:$0xff]   ;;  %v2538_v40 = vld [vmem:[#allocation2 + $0x3f0] ss:$12 sps:$4 sm:$0xff]  }
  0x78   :  { %1129 = vmatpush1.bf16.msra.mxu0 %v2435_v22  ;;  %v2507_v22 = vld [vmem:[#allocation2 + $0x334] ss:$12 sps:$4 sm:$0xff]  }
  0x79   :  { %1130 = vmatprep.subr.bf16.mxu0 %v2442_v23  ;;  %2280 = vmatpush3.bf16.msra.mxu1 %v2499_v43  ;;  %v2505_v23 = vld [vmem:[#allocation2 + $0x330] ss:$12 sps:$4 sm:$0xff]  }
  0x7a   :  { %2281 = vmatprep.subr.bf16.mxu1 %v2503_v44  ;;  %v2546_v43 = vld [vmem:[#allocation2 + $0x424] ss:$12 sps:$4 sm:$0xff]  }
  0x7b   :  { %v2565_v44 = vld [vmem:[#allocation4 + $0x30] ss:$8 sps:$4 sm:$0xff]  }
  0x7c   :  { %1131 = vmatpush1.bf16.msra.mxu0 %v2440_v28  ;;  %v2564_v28 = vld [vmem:[#allocation4 + $0x24] ss:$8 sps:$4 sm:$0xff]  }
  0x7d   :  { %1132 = vmatprep.subr.bf16.mxu0 %v2447_v32  ;;  %2282 = vmatpush3.bf16.msra.mxu1 %v2504_v47  ;;  %v2525_v32 = vld [vmem:[#allocation2 + $0x390] ss:$12 sps:$4 sm:$0xff]  }
  0x7e   :  { %2283 = vmatprep.subr.bf16.mxu1 %v2508_v48  ;;  %v2549_v47 = vld [vmem:[#allocation2 + $0x43c] ss:$12 sps:$4 sm:$0xff]   ;;  %v2547_v48 = vld [vmem:[#allocation2 + $0x438] ss:$12 sps:$4 sm:$0xff]  }
  0x80   :  { %1133 = vmatpush1.bf16.msra.mxu0 %v2445_v35  ;;  %v2534_v35 = vld [vmem:[#allocation2 + $0x3c4] ss:$12 sps:$4 sm:$0xff]  }
  0x81   :  { %1134 = vmatprep.subr.bf16.mxu0 %v2452_v37  ;;  %2284 = vmatpush3.bf16.msra.mxu1 %v2509_v51  ;;  %v2537_v37 = vld [vmem:[#allocation2 + $0x3dc] ss:$12 sps:$4 sm:$0xff]   ;;  %v2555_v51 = vld [vmem:[#allocation2 + $0x46c] ss:$12 sps:$4 sm:$0xff]  }
  0x82   :  { %2285 = vmatprep.subr.bf16.mxu1 %v2513_v52  ;;  %v2553_v52 = vld [vmem:[#allocation2 + $0x468] ss:$12 sps:$4 sm:$0xff]  }
  0x84   :  { %1135 = vmatpush1.bf16.msra.mxu0 %v2450_v38  ;;  %v2535_v38 = vld [vmem:[#allocation2 + $0x3d8] ss:$12 sps:$4 sm:$0xff]  }
  0x85   :  { %1136 = vmatprep.subr.bf16.mxu0 %v2457_v41  ;;  %2286 = vmatpush3.bf16.msra.mxu1 %v2514_v57  ;;  %v2543_v41 = vld [vmem:[#allocation2 + $0x40c] ss:$12 sps:$4 sm:$0xff]  }
  0x86   :  { %2287 = vmatprep.subr.bf16.mxu1 %v2518_v59  ;;  %v2574_v57 = vld [vmem:[#allocation4 + $0x60] ss:$8 sps:$4 sm:$0xff]   ;;  %v2579_v59 = vld [vmem:[#allocation4 + $0x74] ss:$8 sps:$4 sm:$0xff]  }
  0x88   :  { %1137 = vmatpush1.bf16.msra.mxu0 %v2455_v42  ;;  %v2541_v42 = vld [vmem:[#allocation2 + $0x408] ss:$12 sps:$4 sm:$0xff]  }
  0x89   :  { %1138 = vmatprep.subr.bf16.mxu0 %v2462_v45  ;;  %2288 = vmatpush3.bf16.msra.mxu1 %v2519_v62  ;;  %v2567_v45 = vld [vmem:[#allocation4 + $0x34] ss:$8 sps:$4 sm:$0xff]   ;;  %v2580_v62 = vld [vmem:[#allocation4 + $0x80] ss:$8 sps:$4 sm:$0xff]  }
  0x8a   :  { %2289 = vmatprep.subr.bf16.mxu1 %v2523_v63  ;;  %v2585_v63 = vld [vmem:[#allocation4 + $0x94] ss:$8 sps:$4 sm:$0xff]  }
  0x8c   :  { %1139 = vmatpush1.bf16.msra.mxu0 %v2460_v46  ;;  %v2544_v46 = vld [vmem:[#allocation2 + $0x420] ss:$12 sps:$4 sm:$0xff]  }
  0x8d   :  { %1140 = vmatprep.subr.bf16.mxu0 %v2467_v49  ;;  %2290 = vmatpush3.bf16.msra.mxu1 %v2524_v2  ;;  %v2552_v49 = vld [vmem:[#allocation2 + $0x454] ss:$12 sps:$4 sm:$0xff]   ;;  %v2588_v2 = vld [vmem:[#allocation4 + $0xa4] ss:$8 sps:$4 sm:$0xff]  }
  0x8e   :  { %2321 = vmatprep.subr.bf16.mxu1 %v2699_v11 }
  0x90   :  { %1141 = vmatpush1.bf16.msra.mxu0 %v2465_v50  ;;  %1364 = vmatmul.mubr.bf16.vlgmr.msra.gmra.mrb[12].mxu1 %v2815_v7  ;;  %v2550_v50 = vld [vmem:[#allocation2 + $0x450] ss:$12 sps:$4 sm:$0xff]  }
  0x91   :  { %1142 = vmatprep.subr.bf16.mxu0 %v2472_v53  ;;  %2322 = vmatpush3.bf16.msra.mxu1 %v2531_v9  ;;  %v2568_v53 = vld [vmem:[#allocation4 + $0x40] ss:$8 sps:$4 sm:$0xff]  }
  0x92   :  { %2323 = vmatprep.mubr.msk.bf16.mxu1 %vm2700_vm1, %v2699_v11  ;;  %1722 = vmatprep.subr.bf16.mxu1 %v2558_v12  ;;  %v2592_v11 = vld [vmem:[#allocation4 + $0xc0] ss:$8 sps:$4 sm:$0xff]  }
  0x94   :  { %1143 = vmatpush1.bf16.msra.mxu0 %v2470_v55  ;;  %v2571_v55 = vld [vmem:[#allocation4 + $0x50] ss:$8 sps:$4 sm:$0xff]  }
  0x95   :  { %1144 = vmatprep.subr.bf16.mxu0 %v2477_v60  ;;  %v2577_v60 = vld [vmem:[#allocation4 + $0x70] ss:$8 sps:$4 sm:$0xff]  }
  0x98   :  { %1145 = vmatpush1.bf16.msra.mxu0 %v2475_v61  ;;  %2324 = vmatmul.mubr.msk.bf16.vlgmr.msra.gmra.mrb[16].mxu1 %vm1073_vm0, %v2772_v20  ;;  %v2515_v20 = vld [vmem:[#allocation2 + $0x360] ss:$12 sps:$4 sm:$0xff]   ;;  %v2582_v61 = vld [vmem:[#allocation4 + $0x84] ss:$8 sps:$4 sm:$0xff]  }
  0x99   :  { %1146 = vmatprep.subr.bf16.mxu0 %v2482_v1  ;;  %1723 = vmatpush1.bf16.msra.mxu1 %v2556_v15  ;;  %v2583_v1 = vld [vmem:[#allocation4 + $0x90] ss:$8 sps:$4 sm:$0xff]  }
  0x9a   :  { %1724 = vmatprep.subr.bf16.mxu1 %v2561_v18  ;;  %v2597_v18 = vld [vmem:[#allocation4 + $0xd4] ss:$8 sps:$4 sm:$0xff]  }
  0x9c   :  { %1147 = vmatpush1.bf16.msra.mxu0 %v2480_v5 }
  0x9d   :  { %1148 = vmatprep.subr.bf16.mxu0 %v2487_v6  ;;  %1725 = vmatpush1.bf16.msra.mxu1 %v2559_v19  ;;  %v2595_v19 = vld [vmem:[#allocation4 + $0xd0] ss:$8 sps:$4 sm:$0xff]  }
  0x9e   :  { %1726 = vmatprep.subr.bf16.mxu1 %v2564_v28 }
  0xa0   :  { %1149 = vmatpush1.bf16.msra.mxu0 %v2485_v8  ;;  %v2589_v8 = vld [vmem:[#allocation4 + $0xb0] ss:$8 sps:$4 sm:$0xff]  }
  0xa1   :  { %1150 = vmatprep.subr.bf16.mxu0 %v2492_v10  ;;  %1727 = vmatpush1.bf16.msra.mxu1 %v2562_v27  ;;  %v2594_v10 = vld [vmem:[#allocation4 + $0xc4] ss:$8 sps:$4 sm:$0xff]  }
  0xa2   :  { %1728 = vmatprep.subr.bf16.mxu1 %v2567_v45  ;;  %v2633_v45 = vld [vmem:[%s2913_s5 + $0x10] sm:$0xff]  }
  0xa4   :  { %1151 = vmatpush1.bf16.msra.mxu0 %v2490_v13 }
  0xa5   :  { %1163 = vmatprep.subr.bf16.mxu0 %v2497_v14  ;;  %1729 = vmatpush1.bf16.msra.mxu1 %v2565_v44  ;;  %v2632_v44 = vld [vmem:[%s2913_s5 + $0x50] sm:$0xff]  }
  0xa6   :  { %1730 = vmatprep.subr.bf16.mxu1 %v2570_v54 }
  0xa7   :  { %1153 = vmatmul.mubr.bf16.vlgmr.msra.gmra.mrb[0].mxu0 %v2800_v33  ;;  %v2530_v33 = vld [vmem:[#allocation2 + $0x3ac] ss:$12 sps:$4 sm:$0xff]  }
  0xa8   :  { %1164 = vmatpush1.bf16.msra.mxu0 %v2495_v16  ;;  %1195 = vmatprep.mubr.bf16.mxu0 %v74_v58  ;;  %v2576_v58 = vld [vmem:[#allocation4 + $0x64] ss:$8 sps:$4 sm:$0xff]  }
  0xa9   :  { %1165 = vmatprep.subr.bf16.mxu0 %v2502_v17  ;;  %1731 = vmatpush1.bf16.msra.mxu1 %v2568_v53 }
  0xaa   :  { %1732 = vmatprep.subr.bf16.mxu1 %v2573_v56  ;;  %v2637_v56 = vld [vmem:[%s2913_s5 + $0x20] sm:$0xff]  }
  0xac   :  { %1166 = vmatpush1.bf16.msra.mxu0 %v2500_v21  ;;  %v2600_v21 = vld [vmem:[#allocation4 + $0xe4] ss:$8 sps:$4 sm:$0xff]  }
  0xad   :  { %1167 = vmatprep.subr.bf16.mxu0 %v2507_v22  ;;  %1733 = vmatpush1.bf16.msra.mxu1 %v2571_v55  ;;  %v2598_v22 = vld [vmem:[#allocation4 + $0xe0] ss:$8 sps:$4 sm:$0xff]  }
  0xae   :  { %1734 = vmatprep.subr.bf16.mxu1 %v2576_v58  ;;  %v2638_v58 = vld [vmem:[%s2913_s5 + $0x68] sm:$0xff]  }
  0xb0   :  { %1168 = vmatpush1.bf16.msra.mxu0 %v2505_v23  ;;  %v2603_v23 = vld [vmem:[#allocation4 + $0xf4] ss:$8 sps:$4 sm:$0xff]  }
  0xb1   :  { %1169 = vmatprep.subr.bf16.mxu0 %v2512_v24  ;;  %1735 = vmatpush1.bf16.msra.mxu1 %v2574_v57  ;;  %v274_v24 = vlaneseq }
  0xb2   :  { %1736 = vmatprep.subr.bf16.mxu1 %v2579_v59 }
  0xb3   :  { %v2830_v27 = vshrl.u32 %v274_v24, 7 }
  0xb4   :  { %1170 = vmatpush1.bf16.msra.mxu0 %v2510_v25  ;;  %v2601_v25 = vld [vmem:[#allocation4 + $0xf0] ss:$8 sps:$4 sm:$0xff]  }
  0xb5   :  { %1171 = vmatprep.subr.bf16.mxu0 %v2517_v26  ;;  %1737 = vmatpush1.bf16.msra.mxu1 %v2577_v60  ;;  %v2606_v26 = vld [vmem:[#allocation4 + $0x104] ss:$8 sps:$4 sm:$0xff]   ;;  %v284_v28 = vsub.s32 2, %v2830_v27 }
  0xb6   :  { %1738 = vmatprep.subr.bf16.mxu1 %v2582_v61 }
  0xb8   :  { %1172 = vmatpush1.bf16.msra.mxu0 %v2515_v20  ;;  %v272_v20 = vld [vmem:[%s2910_s2] sm:$0x7] }
  0xb9   :  { %1173 = vmatprep.subr.bf16.mxu0 %v2522_v29  ;;  %1739 = vmatpush1.bf16.msra.mxu1 %v2580_v62  ;;  %v285_v29 = vrot.slane %v272_v20, %v284_v28 }
  0xba   :  { %1740 = vmatprep.subr.bf16.mxu1 %v2585_v63 }
  0xbc   :  { %1174 = vmatpush1.bf16.msra.mxu0 %v2520_v30 }
  0xbd   :  { %1175 = vmatprep.subr.bf16.mxu0 %v2527_v31  ;;  %1741 = vmatpush1.bf16.msra.mxu1 %v2583_v1 }
  0xbe   :  { %1742 = vmatprep.subr.bf16.mxu1 %v2588_v2 }
  0xc0   :  { %1176 = vmatpush1.bf16.msra.mxu0 %v2525_v32 }
  0xc1   :  { %1177 = vmatprep.subr.bf16.mxu0 %v2530_v33  ;;  %1743 = vmatpush1.bf16.msra.mxu1 %v2586_v3 }
  0xc2   :  { %1744 = vmatprep.subr.bf16.mxu1 %v2591_v4 }
  0xc4   :  { %1178 = vmatpush1.bf16.msra.mxu0 %v2528_v34 }
  0xc5   :  { %1179 = vmatprep.subr.bf16.mxu0 %v2534_v35  ;;  %1745 = vmatpush1.bf16.msra.mxu1 %v2589_v8  ;;  %v276_v8 = vsub.s32 0, %v2830_v27 }
  0xc6   :  { %1746 = vmatprep.subr.bf16.mxu1 %v2594_v10  ;;  %v280_v10 = vsub.s32 1, %v2830_v27  ;;  %v2205_v27 = vld [vmem:[%s2914_s6] ss:$0 sm:$0xff] }
  0xc8   :  { %1180 = vmatpush1.bf16.msra.mxu0 %v2532_v36 }
  0xc9   :  { %1181 = vmatprep.subr.bf16.mxu0 %v2537_v37  ;;  %1747 = vmatpush1.bf16.msra.mxu1 %v2592_v11  ;;  %v277_v11 = vrot.slane %v272_v20, %v276_v8 }
  0xca   :  { %1748 = vmatprep.subr.bf16.mxu1 %v2597_v18 }
  0xcc   :  { %1182 = vmatpush1.bf16.msra.mxu0 %v2535_v38 }
  0xcd   :  { %1183 = vmatprep.subr.bf16.mxu0 %v2540_v39  ;;  %1749 = vmatpush1.bf16.msra.mxu1 %v2595_v19 }
  0xce   :  { %1750 = vmatprep.subr.bf16.mxu1 %v2600_v21 }
  0xd0   :  { %1184 = vmatpush1.bf16.msra.mxu0 %v2538_v40  ;;  %v2628_v40 = vld [vmem:[%s2913_s5 + $0x40] sm:$0xff]  }
  0xd1   :  { %1185 = vmatprep.subr.bf16.mxu0 %v2543_v41  ;;  %1751 = vmatpush1.bf16.msra.mxu1 %v2598_v22  ;;  %v2629_v41 = vld [vmem:[%s2913_s5] sm:$0xff]  }
  0xd2   :  { %1752 = vmatprep.subr.bf16.mxu1 %v2603_v23 }
  0xd4   :  { %1186 = vmatpush1.bf16.msra.mxu0 %v2541_v42  ;;  %v2630_v42 = vld [vmem:[%s2913_s5 + $0x48] sm:$0xff]  }
  0xd5   :  { %1187 = vmatprep.subr.bf16.mxu0 %v2546_v43  ;;  %1753 = vmatpush1.bf16.msra.mxu1 %v2601_v25  ;;  %v2631_v43 = vld [vmem:[%s2913_s5 + $0x8] sm:$0xff]  }
  0xd6   :  { %1765 = vmatprep.subr.bf16.mxu1 %v2606_v26 }
  0xd8   :  { %1188 = vmatpush1.bf16.msra.mxu0 %v2544_v46  ;;  %v2634_v46 = vld [vmem:[%s2913_s5 + $0x58] sm:$0xff]  }
  0xd9   :  { %1189 = vmatprep.subr.bf16.mxu0 %v2549_v47 }
  0xdc   :  { %1190 = vmatpush1.bf16.msra.mxu0 %v2547_v48 }
  0xdd   :  { %1191 = vmatprep.subr.bf16.mxu0 %v2552_v49  ;;  %v2635_v49 = vld [vmem:[%s2913_s5 + $0x18] sm:$0xff]  }
  0xe0   :  { %1192 = vmatpush1.bf16.msra.mxu0 %v2550_v50 }
  0xe1   :  { %1193 = vmatprep.subr.bf16.mxu0 %v2555_v51 }
  0xe4   :  { %1194 = vmatpush1.bf16.msra.mxu0 %v2553_v52  ;;  %v2636_v52 = vld [vmem:[%s2913_s5 + $0x60] sm:$0xff]  }
  0xe5   :  { %2299 = vmatprep.subr.bf16.mxu0 %v2628_v40  ;;  %v2627_v40 = vld [vmem:[#allocation4 + $0x174] ss:$8 sps:$4 sm:$0xff]  }
  0xe7   :  { %1196 = vmatmul.mubr.bf16.vlgmr.msra.gmra.mrb[0].mxu0 %v2815_v7 }
  0xe8   :  { %2300 = vmatpush3.bf16.msra.mxu0 %v2629_v41  ;;  %v2625_v41 = vld [vmem:[#allocation4 + $0x170] ss:$8 sps:$4 sm:$0xff]  }
  0xe9   :  { %2301 = vmatprep.subr.bf16.mxu0 %v2630_v42  ;;  %v2639_v42 = vld [vmem:[%s2913_s5 + $0x28] sm:$0xff]  }
  0xec   :  { %2302 = vmatpush3.bf16.msra.mxu0 %v2631_v43  ;;  %v2640_v43 = vld [vmem:[%s2913_s5 + $0x70] sm:$0xff]  }
  0xed   :  { %2303 = vmatprep.subr.bf16.mxu0 %v2632_v44  ;;  %v2641_v44 = vld [vmem:[%s2913_s5 + $0x30] sm:$0xff]  }
  0xf0   :  { %2304 = vmatpush3.bf16.msra.mxu0 %v2633_v45  ;;  %v2642_v45 = vld [vmem:[%s2913_s5 + $0x78] sm:$0xff]  }
  0xf1   :  { %2305 = vmatprep.subr.bf16.mxu0 %v2634_v46  ;;  %v2643_v46 = vld [vmem:[%s2913_s5 + $0x38] sm:$0xff]  }
  0xf4   :  { %2306 = vmatpush3.bf16.msra.mxu0 %v2635_v49 }
  0xf5   :  { %2307 = vmatprep.subr.bf16.mxu0 %v2636_v52 }
  0xf8   :  { %2308 = vmatpush3.bf16.msra.mxu0 %v2637_v56 }
  0xf9   :  { %2309 = vmatprep.subr.bf16.mxu0 %v2638_v58 }
  0xfc   :  { %2310 = vmatpush3.bf16.msra.mxu0 %v2639_v42 }
  0xfd   :  { %2311 = vmatprep.subr.bf16.mxu0 %v2640_v43 }
 0x100   :  { %2312 = vmatpush3.bf16.msra.mxu0 %v2641_v44 }
 0x101   :  { %2313 = vmatprep.subr.bf16.mxu0 %v2642_v45 }
 0x103   :  { %v2822_v5 = vpop.f32.mrb[0].mxu1 }
 0x104   :  { %v2824_v6 = vpop.f32.mrb[1].mxu1  ;;  %2314 = vmatpush3.bf16.msra.mxu0 %v2643_v46 }
 0x105   :  { %v2826_v7 = vpop.f32.mrb[2].mxu1 }
 0x106   :  { %v2828_v9 = vpop.f32.mrb[3].mxu1 }
 0x123   :  { %v2247_v12 = vpop.f32.mrb[4].mxu1 }
 0x124   :  { %v2248_v13 = vpop.f32.mrb[5].mxu1 }
 0x125   :  { %v2249_v14 = vadd.f32 %v2248_v13, %v2247_v12  ;;  %v2250_v15 = vpop.f32.mrb[6].mxu1  ;;  %v281_v12 = vrot.slane %v272_v20, %v280_v10 }
 0x126   :  { %v2251_v16 = vpop.f32.mrb[7].mxu1 }
 0x127   :  { %v2252_v17 = vadd.f32 %v2251_v16, %v2250_v15  ;;  %v1284_v30 = vadd.f32 %v2249_v14, %v285_v29 }
 0x129   :  { %v1287_v33 = vadd.f32 %v2252_v17, %v285_v29 }
 0x143   :  { %v2269_v31 = vpop.f32.mrb[8].mxu1 }
 0x144   :  { %v2270_v32 = vpop.f32.mrb[9].mxu1 }
 0x145   :  { %v2271_v34 = vadd.f32 %v2270_v32, %v2269_v31  ;;  %v2272_v35 = vpop.f32.mrb[10].mxu1  ;;  %v2604_v32 = vld [vmem:[#allocation4 + $0x100] ss:$8 sps:$4 sm:$0xff]  }
 0x146   :  { %v2273_v36 = vpop.f32.mrb[11].mxu1 }
 0x147   :  { %v1325_v37 = vadd.f32 %v2271_v34, %v1284_v30  ;;  %v2274_v38 = vadd.f32 %v2273_v36, %v2272_v35  ;;  %v2613_v34 = vld [vmem:[#allocation4 + $0x130] ss:$8 sps:$4 sm:$0xff]   ;;  %v2618_v35 = vld [vmem:[#allocation4 + $0x144] ss:$8 sps:$4 sm:$0xff]   ;;  %v2616_v36 = vld [vmem:[#allocation4 + $0x140] ss:$8 sps:$4 sm:$0xff]  }
 0x149   :  { %v1328_v39 = vadd.f32 %v2274_v38, %v1287_v33  ;;  %v2609_v33 = vld [vmem:[#allocation4 + $0x114] ss:$8 sps:$4 sm:$0xff]   ;;  %v2619_v38 = vld [vmem:[#allocation4 + $0x150] ss:$8 sps:$4 sm:$0xff]  }
 0x163   :  { %v2291_v47 = vpop.f32.mrb[12].mxu1 }
 0x164   :  { %v2292_v48 = vpop.f32.mrb[13].mxu1 }
 0x165   :  { %v2293_v50 = vadd.f32 %v2292_v48, %v2291_v47  ;;  %v2294_v51 = vpop.f32.mrb[14].mxu1  ;;  %v1470_v47 = vld [vmem:[%s2912_s4] sm:$0x3] }
 0x166   :  { %v2295_v53 = vpop.f32.mrb[15].mxu1  ;;  %v1475_v48 = vrot.slane %v1470_v47, %v276_v8  ;;  %v1479_v49 = vrot.slane %v1470_v47, %v280_v10 }
 0x167   :  { %v2296_v54 = vadd.f32 %v2295_v53, %v2294_v51  ;;  %v1366_v55 = vadd.f32 %v2293_v50, %v1325_v37  ;;  %v2621_v37 = vld [vmem:[#allocation4 + $0x154] ss:$8 sps:$4 sm:$0xff]  }
 0x169   :  { %v1369_v57 = vadd.f32 %v2296_v54, %v1328_v39  ;;  %v2624_v39 = vld [vmem:[#allocation4 + $0x164] ss:$8 sps:$4 sm:$0xff]  }
 0x16b   :  { %v1406_v59 = vpop.f32.mrb[16].mxu1 }
 0x16c   :  { %v1407_v60 = vadd.f32 %v1406_v59, %v1366_v55  ;;  %v2325_v61 = vpop.f32.mrb[17].mxu1 }
 0x16d   :  { %v1409_v62 = vpop.f32.mrb[18].mxu1 }
 0x16e   :  { %v1415_v63 = vmax.f32 %v1407_v60, 0.0  ;;  %v1410_v1 = vadd.f32 %v1409_v62, %v1369_v57  ;;  %v2326_v2 = vpop.f32.mrb[19].mxu1 }
 0x170   :  { %v1418_v3 = vmax.f32 %v1410_v1, 0.0 }
 0x172   :  { %v1421_v4 = vpack.c.bf16 %v1418_v3, %v1415_v63 }
 0x1ba   :  { %v1197_v13 = vpop.f32.mrb[0].mxu0 }
 0x1bb   :  { %v2327_v14 = vadd.f32 %v1197_v13, %v277_v11  ;;  %v1199_v15 = vpop.f32.mrb[1].mxu0 }
 0x1bc   :  { %v2329_v16 = vadd.f32 %v1199_v15, %v281_v12  ;;  %v1201_v17 = vpop.f32.mrb[2].mxu0 }
 0x1bd   :  { %v2328_v18 = vadd.f32 %v2327_v14, %v2822_v5  ;;  %v2331_v19 = vadd.f32 %v1201_v17, %v277_v11  ;;  %v1203_v21 = vpop.f32.mrb[3].mxu0  ;;  %v2607_v5 = vld [vmem:[#allocation4 + $0x110] ss:$8 sps:$4 sm:$0xff]  }
 0x1be   :  { %v2330_v22 = vadd.f32 %v2329_v16, %v2824_v6  ;;  %v2333_v23 = vadd.f32 %v1203_v21, %v281_v12  ;;  %v2612_v6 = vld [vmem:[#allocation4 + $0x124] ss:$8 sps:$4 sm:$0xff]  }
 0x1bf   :  { %v2332_v24 = vadd.f32 %v2331_v19, %v2826_v7  ;;  %v1413_v26 = vmax.f32 %v2328_v18, 0.0  ;;  %v2610_v7 = vld [vmem:[#allocation4 + $0x120] ss:$8 sps:$4 sm:$0xff]  }
 0x1c0   :  { %v2334_v25 = vadd.f32 %v2333_v23, %v2828_v9  ;;  %v1414_v29 = vmax.f32 %v2330_v22, 0.0  ;;  %v2615_v9 = vld [vmem:[#allocation4 + $0x134] ss:$8 sps:$4 sm:$0xff]  }
 0x1c1   :  { %v1416_v28 = vmax.f32 %v2332_v24, 0.0 }
 0x1c2   :  { %v1417_v20 = vmax.f32 %v2334_v25, 0.0 }
 0x1c3   :  { %v1419_v30 = vpack.c.bf16 %v1416_v28, %v1413_v26 }
 0x1c4   :  { %v1420_v31 = vpack.c.bf16 %v1417_v20, %v1414_v29 }
 0x1c6   :  { %1754 = vmatprep.mubr.bf16.mxu1 %v1420_v31 }
 0x1c7   :  { %1755 = vmatmul.mubr.bf16.vlgmr.msra.gmra.mrb[20].mxu1 %v1419_v30 }
 0x1c8   :  { %1766 = vmatpush1.bf16.msra.mxu1 %v2604_v32  ;;  %1797 = vmatprep.mubr.bf16.mxu1 %v2698_v0  ;;  %v2622_v0 = vld [vmem:[#allocation4 + $0x160] ss:$8 sps:$4 sm:$0xff]  }
 0x1c9   :  { %1767 = vmatprep.subr.bf16.mxu1 %v2609_v33 }
 0x1cc   :  { %1768 = vmatpush1.bf16.msra.mxu1 %v2607_v5 }
 0x1cd   :  { %1769 = vmatprep.subr.bf16.mxu1 %v2612_v6 }
 0x1d0   :  { %1770 = vmatpush1.bf16.msra.mxu1 %v2610_v7 }
 0x1d1   :  { %1771 = vmatprep.subr.bf16.mxu1 %v2615_v9 }
 0x1d4   :  { %1772 = vmatpush1.bf16.msra.mxu1 %v2613_v34 }
 0x1d5   :  { %1773 = vmatprep.subr.bf16.mxu1 %v2618_v35 }
 0x1d8   :  { %1774 = vmatpush1.bf16.msra.mxu1 %v2616_v36 }
 0x1d9   :  { %1775 = vmatprep.subr.bf16.mxu1 %v2621_v37 }
 0x1dc   :  { %1776 = vmatpush1.bf16.msra.mxu1 %v2619_v38 }
 0x1dd   :  { %1777 = vmatprep.subr.bf16.mxu1 %v2624_v39 }
 0x1e0   :  { %1778 = vmatpush1.bf16.msra.mxu1 %v2622_v0 }
 0x1e1   :  { %1779 = vmatprep.subr.bf16.mxu1 %v2627_v40 }
 0x1e4   :  { %1780 = vmatpush1.bf16.msra.mxu1 %v2625_v41 }
 0x1e7   :  { %1798 = vmatmul.mubr.bf16.vlgmr.msra.gmra.mrb[20].mxu1 %v1421_v4 }
 0x2ba   :  { %v1799_v50 = vpop.f32.mrb[20].mxu1 }
 0x2bb   :  { %v2335_v51 = vadd.f32 %v1799_v50, %v1475_v48  ;;  %v1801_v52 = vpop.f32.mrb[21].mxu1 }
 0x2bc   :  { %v2336_v53 = vadd.f32 %v1801_v52, %v1479_v49  ;;  %v1803_v54 = vpop.f32.mrb[22].mxu1 }
 0x2bd   :  { %v2337_v55 = vadd.f32 %v1803_v54, %v1475_v48  ;;  %v1805_v56 = vpop.f32.mrb[23].mxu1  ;;  %v1808_v58 = vmax.f32 %v2335_v51, 0.0 }
 0x2be   :  { %v2338_v57 = vadd.f32 %v1805_v56, %v1479_v49  ;;  %v1809_v60 = vmax.f32 %v2336_v53, 0.0 }
 0x2bf   :  { %v1810_v59 = vmax.f32 %v2337_v55, 0.0 }
 0x2c0   :  { %v1811_v61 = vmax.f32 %v2338_v57, 0.0 }
 0x2c1   :  { %v1812_v62 = vpack.c.bf16 %v1810_v59, %v1808_v58 }
 0x2c2   :  { %v1813_v63 = vpack.c.bf16 %v1811_v61, %v1809_v60 }
 0x2c4   :  { %1981 = vmatprep.mubr.bf16.mxu0 %v1813_v63 }
 0x2c5   :  { %1982 = vmatmul.mubr.bf16.vlgmr.msra.gmra.mrb[4].mxu0 %v1812_v62 }
 0x398   :  { %v2315_v1 = vpop.f32.mrb[4].mxu0 }
 0x399   :  { %v2316_v2 = vpop.f32.mrb[5].mxu0 }
 0x39a   :  { %v2317_v3 = vadd.f32 %v2316_v2, %v2315_v1  ;;  %v2318_v4 = vpop.f32.mrb[6].mxu0 }
 0x39b   :  { %v2319_v8 = vpop.f32.mrb[7].mxu0 }
 0x39c   :  { %v1984_v10 = vadd.f32 %v2317_v3, %v2205_v27  ;;  %v2320_v11 = vadd.f32 %v2319_v8, %v2318_v4 }
 0x39e   :  { %v1987_v12 = vadd.f32 %v2320_v11, %v2205_v27  ;;  %v1990_v13 = vmax.f32 %v1984_v10, 0.0 }
 0x3a0   :  { %v1991_v14 = vmax.f32 %v1987_v12, 0.0 }
 0x3a2   :  { %v2229_v15 = vpack.c.bf16 %v1991_v14, %v1990_v13 }
 0x3a4   :  { %2230 = vst [vmem:[%s2915_s7] sm:$0xff] %v2229_v15  }
 0x3a5   :  { %2006 = vsyncpa [#allocation3], 1 }
 0x3a6   :  { %2007 = vsyncpa [#allocation5], 1 }

</bundles_post_ra>
